<compile_context>
chip_gen: v7x
topology: tpu7x:2x2x1
jax: 0.10.0
libtpu: 0.0.40
codegen_flags: <defaults>
</compile_context>

<pallas_src>
import jax
import jax.numpy as jnp
from jax.experimental import pallas as pl
from jax.experimental.pallas import tpu as pltpu

MARGIN = 0.4
DOWNWEIGHT = 0.5
_LANES = 512                      # lane-dense slab width (multiple of 128)
_TARGET_BLOCK_BYTES = 1 << 20     # ~1 MiB per input stream per block


def _margin_kernel(labels_ref, logits_ref, out_ref):
    labels = labels_ref[...]
    raw_logits = logits_ref[...]

    logits = raw_logits - 0.5
    pos_sq = jnp.square(logits - MARGIN)
    neg_sq = jnp.square(logits + MARGIN)

    # torch.le(logits, margin) / torch.gt(logits, -margin) masks via where
    positive_cost = labels * jnp.where(logits <= MARGIN, pos_sq, 0.0)
    negative_cost = (1.0 - labels) * jnp.where(logits > -MARGIN, neg_sq, 0.0)

    # 0.5 * pos + downweight * 0.5 * neg  (constants folded)
    out_ref[...] = 0.5 * positive_cost + (DOWNWEIGHT * 0.5) * negative_cost


def margin_loss_pallas(labels, raw_logits):
    """Elementwise margin loss; matches margin_loss(labels, raw_logits)."""
    assert labels.shape == raw_logits.shape
    dtype = raw_logits.dtype
    labels = labels.astype(dtype)
    orig_shape = raw_logits.shape

    n = raw_logits.size
    itemsize = jnp.dtype(dtype).itemsize

    # Size blocks: lane-dense (512 lanes), rows chosen for ~1 MiB per stream,
    # rounded to a multiple of 8 sublanes, never exceeding what the input needs.
    rows_needed = pl.cdiv(n, _LANES)
    rows_needed8 = pl.cdiv(rows_needed, 8) * 8
    max_tile_rows = max(8, (_TARGET_BLOCK_BYTES // (_LANES * itemsize)) // 8 * 8)
    tile_rows = min(max_tile_rows, rows_needed8)

    rows = pl.cdiv(rows_needed, tile_rows) * tile_rows
    padded = rows * _LANES

    flat_logits = jnp.ravel(raw_logits)
    flat_labels = jnp.ravel(labels)
    if padded != n:
        flat_logits = jnp.pad(flat_logits, (0, padded - n))
        flat_labels = jnp.pad(flat_labels, (0, padded - n))
    logits2d = flat_logits.reshape(rows, _LANES)
    labels2d = flat_labels.reshape(rows, _LANES)

    grid = (rows // tile_rows,)
    spec = pl.BlockSpec((tile_rows, _LANES), lambda i: (i, 0))

    cost = pl.CostEstimate(
        flops=8 * padded,
        transcendentals=0,
        bytes_accessed=3 * padded * itemsize,
    )

    out2d = pl.pallas_call(
        _margin_kernel,
        out_shape=jax.ShapeDtypeStruct((rows, _LANES), dtype),
        grid_spec=pl.GridSpec(
            grid=grid,
            in_specs=[spec, spec],
            out_specs=spec,
        ),
        compiler_params=pltpu.CompilerParams(
            dimension_semantics=("parallel",),
        ),
        cost_estimate=cost,
    )(labels2d, logits2d)

    return out2d.reshape(-1)[:n].reshape(orig_shape)


def margin_loss_ref(labels, raw_logits, margin=MARGIN, downweight=DOWNWEIGHT):
    logits = raw_logits - 0.5
    positive_cost = (
        labels * (logits <= margin).astype(logits.dtype) * jnp.square(logits - margin)
    )
    negative_cost = (
        (1.0 - labels)
        * (logits > -margin).astype(logits.dtype)
        * jnp.square(logits + margin)
    )
    return 0.5 * positive_cost + downweight * 0.5 * negative_cost


if __name__ == "__main__":
    key = jax.random.PRNGKey(0)

    # Case 1: realistic CapsNet-ish shape (C=10, not a multiple of 128).
    k1, k2, k3, k4 = jax.random.split(key, 4)
    B1, C1 = 8, 10
    labels1 = (jax.random.uniform(k1, (B1, C1)) > 0.8).astype(jnp.float32)
    logits1 = jax.random.uniform(k2, (B1, C1), dtype=jnp.float32)
    out1 = jax.block_until_ready(margin_loss_pallas(labels1, logits1))
    ref1 = margin_loss_ref(labels1, logits1)
    assert out1.shape == ref1.shape and out1.dtype == ref1.dtype
    assert jnp.allclose(out1, ref1, atol=1e-6, rtol=1e-6)

    # Case 2: tile-aligned shape.
    B2, C2 = 8, 128
    labels2 = (jax.random.uniform(k3, (B2, C2)) > 0.9).astype(jnp.float32)
    logits2 = jax.random.uniform(k4, (B2, C2), dtype=jnp.float32)
    out2 = jax.block_until_ready(margin_loss_pallas(labels2, logits2))
    ref2 = margin_loss_ref(labels2, logits2)
    assert out2.shape == ref2.shape and out2.dtype == ref2.dtype
    assert jnp.allclose(out2, ref2, atol=1e-6, rtol=1e-6)

    print("KERNEL_OK")
</pallas_src>

<mosaic_0001>
module attributes {stable_mosaic.version = 11 : i64} {
  func.func @_margin_kernel(%arg0: i32, %arg1: memref<8x512xf32, #tpu.memory_space<vmem>>, %arg2: memref<8x512xf32, #tpu.memory_space<vmem>>, %arg3: memref<8x512xf32, #tpu.memory_space<vmem>>) attributes {dimension_semantics = [#tpu.dimension_semantics<parallel>], iteration_bounds = array<i64: 1>, scalar_prefetch = 0 : i64, scratch_operands = 0 : i64, tpu.core_type = #tpu.core_type<tc>, window_params = [{transform_indices = @transform_0, window_bounds = array<i64: 8, 512>}, {transform_indices = @transform_1, window_bounds = array<i64: 8, 512>}, {transform_indices = @transform_2, window_bounds = array<i64: 8, 512>}]} {
    %c0 = arith.constant 0 : index
    %c0_0 = arith.constant 0 : index
    %0 = vector.load %arg1[%c0, %c0_0] : memref<8x512xf32, #tpu.memory_space<vmem>>, vector<8x512xf32>
    %c0_1 = arith.constant 0 : index
    %c0_2 = arith.constant 0 : index
    %1 = vector.load %arg2[%c0_1, %c0_2] : memref<8x512xf32, #tpu.memory_space<vmem>>, vector<8x512xf32>
    %cst = arith.constant 5.000000e-01 : f32
    %2 = vector.broadcast %cst : f32 to vector<8x512xf32>
    %3 = arith.subf %1, %2 : vector<8x512xf32>
    %cst_3 = arith.constant 4.000000e-01 : f32
    %4 = vector.broadcast %cst_3 : f32 to vector<8x512xf32>
    %5 = arith.subf %3, %4 : vector<8x512xf32>
    %6 = arith.mulf %5, %5 : vector<8x512xf32>
    %cst_4 = arith.constant 4.000000e-01 : f32
    %7 = vector.broadcast %cst_4 : f32 to vector<8x512xf32>
    %8 = arith.addf %3, %7 : vector<8x512xf32>
    %9 = arith.mulf %8, %8 : vector<8x512xf32>
    %cst_5 = arith.constant 4.000000e-01 : f32
    %10 = vector.broadcast %cst_5 : f32 to vector<8x512xf32>
    %11 = arith.cmpf ole, %3, %10 : vector<8x512xf32>
    %cst_6 = arith.constant 0.000000e+00 : f32
    %12 = vector.broadcast %cst_6 : f32 to vector<8x512xf32>
    %13 = arith.select %11, %6, %12 : vector<8x512xi1>, vector<8x512xf32>
    %14 = arith.mulf %0, %13 : vector<8x512xf32>
    %cst_7 = arith.constant 1.000000e+00 : f32
    %15 = vector.broadcast %cst_7 : f32 to vector<8x512xf32>
    %16 = arith.subf %15, %0 : vector<8x512xf32>
    %cst_8 = arith.constant -4.000000e-01 : f32
    %17 = vector.broadcast %cst_8 : f32 to vector<8x512xf32>
    %18 = arith.cmpf ogt, %3, %17 : vector<8x512xf32>
    %cst_9 = arith.constant 0.000000e+00 : f32
    %19 = vector.broadcast %cst_9 : f32 to vector<8x512xf32>
    %20 = arith.select %18, %9, %19 : vector<8x512xi1>, vector<8x512xf32>
    %21 = arith.mulf %16, %20 : vector<8x512xf32>
    %cst_10 = arith.constant 5.000000e-01 : f32
    %22 = vector.broadcast %cst_10 : f32 to vector<8x512xf32>
    %23 = arith.mulf %22, %14 : vector<8x512xf32>
    %cst_11 = arith.constant 2.500000e-01 : f32
    %24 = vector.broadcast %cst_11 : f32 to vector<8x512xf32>
    %25 = arith.mulf %24, %21 : vector<8x512xf32>
    %26 = arith.addf %23, %25 : vector<8x512xf32>
    %c0_12 = arith.constant 0 : index
    %c0_13 = arith.constant 0 : index
    %27 = vector.load %arg3[%c0_12, %c0_13] : memref<8x512xf32, #tpu.memory_space<vmem>>, vector<8x512xf32>
    tpu.vector_store %arg3[%c0_12, %c0_13], %26 {strides = array<i32>} : memref<8x512xf32, #tpu.memory_space<vmem>>, vector<8x512xf32>,
    return
  }
  func.func @transform_0(%arg0: i32) -> (i32, i32) {
    %c0_i32 = arith.constant 0 : i32
    %c0_i32_0 = arith.constant 0 : i32
    return %arg0, %c0_i32 : i32, i32
  }
  func.func @transform_1(%arg0: i32) -> (i32, i32) {
    %c0_i32 = arith.constant 0 : i32
    %c0_i32_0 = arith.constant 0 : i32
    return %arg0, %c0_i32 : i32, i32
  }
  func.func @transform_2(%arg0: i32) -> (i32, i32) {
    %c0_i32 = arith.constant 0 : i32
    %c0_i32_0 = arith.constant 0 : i32
    return %arg0, %c0_i32 : i32, i32
  }
}

</mosaic_0001>

<bundles_post_ra>
// kernel: tpu_custom_call.1
= control target key start
LH: loop header
LB: loop body
LE: loop exit
PB: predicated region body
PF: predicated region fallthrough
CT: control target
= control target key end

     0   :  { %7 = vsyncpa [#allocation3], 0  ;;  %s263_s0 = inlined_call_operand.hbm [shape: f32[8,512], index: 0, kind: input, shape index: {}]   ;;  %s264_s1 = inlined_call_operand.hbm [shape: f32[8,512], index: 1, kind: input, shape index: {}]   ;;  %s265_s2 = inlined_call_operand.hbm [shape: f32[8,512], index: 2, kind: output, shape index: {}]  }
   0x1   :  { %8 = vsyncpa [#allocation6], 0 }
   0x2   :  { %9 = vsyncpa [#allocation4], 0  ;;  %s207_s9 = smov [#allocation2]   ;;  %s208_s11 = smov [#allocation5]  }
   0x3   :  { %s16_s10 = sshll.u32 %s207_s9, 4  ;;  %s26_s12 = sshll.u32 %s208_s11, 4  ;;  %s17_s10 = int_to_ptr.vmem [resolvable:$true] %s16_s10  ;;  %s27_s12 = int_to_ptr.vmem [resolvable:$true] %s26_s12 }
   0x4   :  { %s135_s15 = scalar_lea.hbm %s263_s0, 512 }
   0x5   :  { %p136_p0 = scmp.ne.s32.totalorder %s263_s0, %s135_s15  ;;  %p139_p1 = scmp.lt.u32.totalorder %s135_s15, %s263_s0 }
   0x7   :  { %p141_p2 = pnand %p139_p1, %p136_p0 }
   0x9   :  { %144 = shalt.err (!%p141_p2)
}
   0xa   :  { %s145_s20 = scalar_lea.vmem %s17_s10, 512  ;;  %p150_p4 = scmp.lt.s32.totalorder %s17_s10, %s17_s10 }
   0xb   :  { %p146_p3 = scmp.ne.s32.totalorder %s17_s10, %s145_s20  ;;  %p151_p5 = scmp.lt.s32.totalorder %s145_s20, %s145_s20 }
   0xd   :  { %p152_p6 = por %p151_p5, %p150_p4 }
   0xf   :  { %p153_p7 = pnand %p152_p6, %p146_p3 }
  0x11   :  { %156 = shalt.err (!%p153_p7)
}
  0x12   :  { %19 = dma.hbm_to_vmem [thread:$0]  %s263_s0, 512, %s17_s10, [#allocation3]  }
  0x13   :  { %s157_s25 = scalar_lea.hbm %s264_s1, 512 }
  0x14   :  { %p158_p8 = scmp.ne.s32.totalorder %s264_s1, %s157_s25  ;;  %p161_p9 = scmp.lt.u32.totalorder %s157_s25, %s264_s1 }
  0x16   :  { %p163_p10 = pnand %p161_p9, %p158_p8 }
  0x18   :  { %166 = shalt.err (!%p163_p10)
}
  0x19   :  { %s167_s30 = scalar_lea.vmem %s27_s12, 512  ;;  %p172_p12 = scmp.lt.s32.totalorder %s27_s12, %s27_s12 }
  0x1a   :  { %p168_p11 = scmp.ne.s32.totalorder %s27_s12, %s167_s30  ;;  %p173_p13 = scmp.lt.s32.totalorder %s167_s30, %s167_s30 }
  0x1c   :  { %p174_p0 = por %p173_p13, %p172_p12 }
  0x1e   :  { %p175_p1 = pnand %p174_p0, %p168_p11 }
  0x20   :  { %178 = shalt.err (!%p175_p1)
}
  0x21   :  { %29 = dma.hbm_to_vmem [thread:$0]  %s264_s1, 512, %s27_s12, [#allocation6]  }
  0x22   :  { %201 = dma.done.wait [#allocation3], 512  }
  0x23   :  { %202 = vsyncadd [#allocation3], 4294966784 }
  0x24   :  { %203 = dma.done.wait [#allocation6], 512  }
  0x25   :  { %204 = vsyncadd [#allocation6], 4294966784  ;;  %v36_v0 = vld [vmem:[#allocation2] sm:$0xff]  ;;  %v37_v2 = vld [vmem:[#allocation2 + $0x8] sm:$0xff]  ;;  %s209_s1 = smov [#allocation7]  }
  0x26   :  { %v40_v1 = vld [vmem:[#allocation5] sm:$0xff]  ;;  %v76_v4 = vsub.f32 1.0, %v36_v0  ;;  %v41_v5 = vld [vmem:[#allocation5 + $0x8] sm:$0xff]  ;;  %v38_v6 = vld [vmem:[#allocation2 + $0x10] sm:$0xff]  ;;  %v77_v9 = vsub.f32 1.0, %v37_v2  ;;  %s114_s4 = sshll.u32 %s209_s1, 4  ;;  %s115_s4 = int_to_ptr.vmem [resolvable:$true] %s114_s4 }
  0x27   :  { %v124_v3 = vadd.f32 -0.5, %v40_v1  ;;  %v42_v7 = vld [vmem:[#allocation5 + $0x10] sm:$0xff]  ;;  %v125_v8 = vadd.f32 -0.5, %v41_v5  ;;  %v78_v11 = vsub.f32 1.0, %v38_v6  ;;  %v43_v22 = vld [vmem:[#allocation5 + $0x18] sm:$0xff]  ;;  %s179_s5 = scalar_lea.vmem %s115_s4, 512  ;;  %p184_p3 = scmp.lt.s32.totalorder %s115_s4, %s115_s4 }
  0x28   :  { %v126_v10 = vadd.f32 -0.5, %v42_v7  ;;  %v39_v35 = vld [vmem:[#allocation2 + $0x18] sm:$0xff]  ;;  %v127_v36 = vadd.f32 -0.5, %v43_v22  ;;  %p180_p2 = scmp.ne.s32.totalorder %s115_s4, %s179_s5  ;;  %p185_p4 = scmp.lt.s32.totalorder %s179_s5, %s179_s5 }
  0x29   :  { %v128_v12 = vadd.f32 -0.4, %v124_v3  ;;  %v56_v13 = vadd.f32 0.4, %v124_v3  ;;  %vm64_vm0 = vcmp.le.f32.partialorder %v124_v3, 0.4 }
  0x2a   :  { %vm80_vm1 = vcmp.gt.f32.partialorder %v124_v3, -0.4  ;;  %v129_v14 = vadd.f32 -0.4, %v125_v8  ;;  %v57_v15 = vadd.f32 0.4, %v125_v8  ;;  %p186_p5 = por %p185_p4, %p184_p3 }
  0x2b   :  { %v52_v16 = vmul.f32 %v128_v12, %v128_v12  ;;  %v60_v17 = vmul.f32 %v56_v13, %v56_v13  ;;  %vm65_vm2 = vcmp.le.f32.partialorder %v125_v8, 0.4  ;;  %vm81_vm3 = vcmp.gt.f32.partialorder %v125_v8, -0.4 }
  0x2c   :  { %v53_v18 = vmul.f32 %v129_v14, %v129_v14  ;;  %v61_v19 = vmul.f32 %v57_v15, %v57_v15  ;;  %v130_v20 = vadd.f32 -0.4, %v126_v10  ;;  %v58_v21 = vadd.f32 0.4, %v126_v10  ;;  %p187_p6 = pnand %p186_p5, %p180_p2 }
  0x2d   :  { %v68_v23 = vsel %vm64_vm0, %v52_v16, 0.0  ;;  %v84_v24 = vsel %vm80_vm1, %v60_v17, 0.0  ;;  %vm66_vm4 = vcmp.le.f32.partialorder %v126_v10, 0.4  ;;  %vm82_vm5 = vcmp.gt.f32.partialorder %v126_v10, -0.4 }
  0x2e   :  { %v72_v25 = vmul.f32 %v68_v23, %v36_v0  ;;  %v88_v26 = vmul.f32 %v84_v24, %v76_v4  ;;  %v69_v27 = vsel %vm65_vm2, %v53_v18, 0.0  ;;  %v85_v28 = vsel %vm81_vm3, %v61_v19, 0.0 }
  0x2f   :  { %v73_v29 = vmul.f32 %v69_v27, %v37_v2  ;;  %v89_v30 = vmul.f32 %v85_v28, %v77_v9  ;;  %v54_v31 = vmul.f32 %v130_v20, %v130_v20  ;;  %v62_v32 = vmul.f32 %v58_v21, %v58_v21 }
  0x30   :  { %v92_v33 = vmul.f32 0.5, %v72_v25  ;;  %v96_v34 = vmul.f32 0.25, %v88_v26  ;;  %v131_v44 = vadd.f32 -0.4, %v127_v36  ;;  %v59_v46 = vadd.f32 0.4, %v127_v36 }
  0x31   :  { %v93_v37 = vmul.f32 0.5, %v73_v29  ;;  %v97_v38 = vmul.f32 0.25, %v89_v30  ;;  %v70_v39 = vsel %vm66_vm4, %v54_v31, 0.0  ;;  %v86_v40 = vsel %vm82_vm5, %v62_v32, 0.0 }
  0x32   :  { %v100_v41 = vadd.f32 %v96_v34, %v92_v33  ;;  %v74_v42 = vmul.f32 %v70_v39, %v38_v6  ;;  %v90_v43 = vmul.f32 %v86_v40, %v78_v11  ;;  %vm67_vm6 = vcmp.le.f32.partialorder %v127_v36, 0.4 }
  0x33   :  { %v101_v45 = vadd.f32 %v97_v38, %v93_v37  ;;  %v79_v47 = vsub.f32 1.0, %v39_v35  ;;  %v55_v50 = vmul.f32 %v131_v44, %v131_v44  ;;  %vm83_vm7 = vcmp.gt.f32.partialorder %v127_v36, -0.4 }
  0x34   :  { %104 = vst [vmem:[#allocation7] sm:$0xff] %v100_v41  ;;  %v94_v48 = vmul.f32 0.5, %v74_v42  ;;  %v98_v49 = vmul.f32 0.25, %v90_v43  ;;  %v63_v51 = vmul.f32 %v59_v46, %v59_v46 }
  0x35   :  { %105 = vst [vmem:[#allocation7 + $0x8] sm:$0xff] %v101_v45  ;;  %v71_v53 = vsel %vm67_vm6, %v55_v50, 0.0 }
  0x36   :  { %v102_v52 = vadd.f32 %v98_v49, %v94_v48  ;;  %v75_v54 = vmul.f32 %v71_v53, %v39_v35  ;;  %v87_v55 = vsel %vm83_vm7, %v63_v51, 0.0 }
  0x37   :  { %v91_v56 = vmul.f32 %v87_v55, %v79_v47 }
  0x38   :  { %106 = vst [vmem:[#allocation7 + $0x10] sm:$0xff] %v102_v52  ;;  %v95_v57 = vmul.f32 0.5, %v75_v54 }
  0x39   :  { %v99_v58 = vmul.f32 0.25, %v91_v56 }
  0x3b   :  { %v103_v59 = vadd.f32 %v99_v58, %v95_v57 }
  0x3d   :  { %107 = vst [vmem:[#allocation7 + $0x18] sm:$0xff] %v103_v59 }
  0x3e   :  { %190 = shalt.err (!%p187_p6)
}
  0x3f   :  { %s191_s8 = scalar_lea.hbm %s265_s2, 512 }
  0x40   :  { %p192_p7 = scmp.ne.s32.totalorder %s265_s2, %s191_s8  ;;  %p195_p8 = scmp.lt.u32.totalorder %s191_s8, %s265_s2 }
  0x42   :  { %p197_p9 = pnand %p195_p8, %p192_p7 }
  0x44   :  { %200 = shalt.err (!%p197_p9)
}
  0x45   :  { %117 = dma.vmem_to_hbm [thread:$0]  %s115_s4, 512, %s265_s2, [#allocation4]  }
  0x46   :  { %205 = dma.done.wait [#allocation4], 512  }
  0x47   :  { %206 = vsyncadd [#allocation4], 4294966784 }
  0x48   :  { %121 = vsyncpa [#allocation3], 1 }
  0x49   :  { %122 = vsyncpa [#allocation6], 1 }
  0x4a   :  { %123 = vsyncpa [#allocation4], 1 }

</bundles_post_ra>
